<compile_context>
chip_gen: v5e
topology: v5e:2x2
jax: 0.10.0
libtpu: 0.0.40
codegen_flags: <defaults>
</compile_context>

<pallas_src>
import functools

import jax
import jax.numpy as jnp
from jax import lax
from jax.experimental import pallas as pl
from jax.experimental.pallas import tpu as pltpu


_CHUNK_ROWS = 64  # rows gathered per pipeline step (multiple of 8)


# ------------------------------------------------------------------ helpers -

def _next_pow2_ge8(n):
    return 1 << max(3, (int(n) - 1).bit_length())


def _fold8(v, op):
    """[CHUNK, D] -> [8, D] using only VPU ops on aligned 8-row slices."""
    part = v[0:8, :]
    for g in range(1, v.shape[0] // 8):
        part = op(part, v[g * 8:(g + 1) * 8, :])
    return part


# ------------------------------------------------------------------- kernel -

def _agg_kernel(cnt_ref, idx_ref, table_ref, *rest, agg, chunk, d):
    # cnt_ref: SMEM (1,) int32 true neighbor count
    # idx_ref: SMEM (NB,) int32 neighbor rows (padded with 0, masked below)
    # table_ref: HBM [n_nodes, d] f32 (memory_space=pl.ANY)
    if agg == "pool":
        wt_ref, b_ref, o_ref, buf, sem, acc = rest
    else:
        o_ref, buf, sem, acc = rest

    count = cnt_ref[0]
    n_chunks = pl.cdiv(count, chunk)  # >= 1 (count >= 1 enforced by wrapper)

    def fetch(c, slot):
        base = c * chunk
        dst0 = slot * chunk

        @pl.loop(0, chunk)
        def _(r):
            row = idx_ref[base + r]
            pltpu.make_async_copy(
                table_ref.at[pl.ds(row, 1), :],
                buf.at[pl.ds(dst0 + r, 1), :],
                sem.at[slot],
            ).start()

    def wait_chunk(slot):
        dst0 = slot * chunk

        @pl.loop(0, chunk)
        def _(r):
            pltpu.make_async_copy(
                table_ref.at[pl.ds(0, 1), :],
                buf.at[pl.ds(dst0 + r, 1), :],
                sem.at[slot],
            ).wait()

    # Prime the pipeline with chunk 0 while we init the accumulator.
    fetch(0, 0)

    if agg == "mean":
        acc[...] = jnp.zeros_like(acc)
    else:
        acc[...] = jnp.full_like(acc, -jnp.inf)

    row_iota = lax.broadcasted_iota(jnp.int32, (chunk, d), 0)

    @pl.loop(0, n_chunks)
    def _(c):
        slot = c & 1
        wait_chunk(slot)

        @pl.when(c + 1 < n_chunks)
        def _():
            fetch(c + 1, 1 - slot)

        start = pl.multiple_of(slot * chunk, chunk)
        x = buf[pl.ds(start, chunk), :]                    # [chunk, d] f32
        valid = (c * chunk + row_iota) < count             # ragged-tail mask

        if agg == "mean":
            xm = jnp.where(valid, x, 0.0)
            acc[...] = acc[...] + _fold8(xm, jnp.add)
        elif agg == "max":
            xm = jnp.where(valid, x, -jnp.inf)
            acc[...] = jnp.maximum(acc[...], _fold8(xm, jnp.maximum))
        else:  # pool: row-max of (x @ W^T); bias added after the max
            z = jnp.dot(x, wt_ref[...], preferred_element_type=jnp.float32)
            zm = jnp.where(valid, z, -jnp.inf)
            acc[...] = jnp.maximum(acc[...], _fold8(zm, jnp.maximum))

    # Finalize: the only cross-sublane (XLU) reduce, on an [8, d] tile.
    if agg == "mean":
        total = jnp.sum(acc[...], axis=0, keepdims=True)        # [1, d]
        o_ref[...] = total / count.astype(jnp.float32)          # true 1/n
    elif agg == "max":
        o_ref[...] = jnp.max(acc[...], axis=0, keepdims=True)
    else:
        zmax = jnp.max(acc[...], axis=0, keepdims=True)
        o_ref[...] = jax.nn.sigmoid(zmax + b_ref[...])


# ------------------------------------------------------------------ wrapper -

@functools.partial(jax.jit, static_argnames=("agg_method",))
def _aggregate(count, idx, table, wt, b, *, agg_method):
    """count: (1,) int32; idx: (NB,) int32; table: (n_nodes, D) f32."""
    nb = idx.shape[0]
    _, d = table.shape
    chunk = min(_CHUNK_ROWS, nb)          # nb is a pow2 >= 8 -> divides evenly

    kernel = functools.partial(_agg_kernel, agg=agg_method, chunk=chunk, d=d)

    in_specs = [pl.BlockSpec(memory_space=pl.ANY)]        # table stays in HBM
    args = [count, idx, table]
    if agg_method == "pool":
        in_specs += [
            pl.BlockSpec((d, d), lambda i, cnt, ind: (0, 0)),   # W^T (resident)
            pl.BlockSpec((1, d), lambda i, cnt, ind: (0, 0)),   # bias
        ]
        args += [wt, b]

    # VMEM budget (bytes) with headroom; capped so it is valid on v7x (64 MiB).
    need = (2 * chunk * d + 8 * d + d) * 4
    if agg_method == "pool":
        need += (2 * d * d + 2 * d + chunk * d) * 4
    vmem_limit = int(min(max(32 << 20, 2 * need + (4 << 20)), 60 << 20))

    if agg_method == "pool":
        cost = pl.CostEstimate(
            flops=int(2 * nb * d * d + nb * d), transcendentals=int(d),
            bytes_accessed=int((nb * d + d * d + 2 * d + nb + 1) * 4))
    else:
        cost = pl.CostEstimate(
            flops=int(nb * d), transcendentals=0,
            bytes_accessed=int((nb * d + d + nb + 1) * 4))

    out = pl.pallas_call(
        kernel,
        out_shape=jax.ShapeDtypeStruct((1, d), jnp.float32),
        grid_spec=pltpu.PrefetchScalarGridSpec(
            num_scalar_prefetch=2,
            grid=(1,),
            in_specs=in_specs,
            out_specs=pl.BlockSpec((1, d), lambda i, cnt, ind: (0, 0)),
            scratch_shapes=[
                pltpu.VMEM((2 * chunk, d), jnp.float32),   # gather double-buffer
                pltpu.SemaphoreType.DMA((2,)),
                pltpu.VMEM((8, d), jnp.float32),           # VPU accumulator
            ],
        ),
        compiler_params=pltpu.CompilerParams(
            dimension_semantics=("arbitrary",),
            vmem_limit_bytes=vmem_limit,
        ),
        cost_estimate=cost,
    )(*args)
    return out[0]


class Aggregator:
    """JAX/Pallas port of the PyTorch GraphSAGE Aggregator (forward only)."""

    def __init__(self, input_dim, agg_method="mean", key=None):
        assert agg_method in ["mean", "max", "pool"]
        self.input_dim = input_dim
        self.agg_method = agg_method
        self.weight = None
        self.bias = None
        self._wt = None
        self._b = None
        if agg_method == "pool":
            if key is None:
                key = jax.random.PRNGKey(0)
            kw, kb = jax.random.split(key)
            # nn.Linear default init: U(-1/sqrt(D), 1/sqrt(D))
            bound = 1.0 / (input_dim ** 0.5)
            self.weight = jax.random.uniform(
                kw, (input_dim, input_dim), jnp.float32, -bound, bound)
            self.bias = jax.random.uniform(
                kb, (input_dim,), jnp.float32, -bound, bound)
            self._wt = jnp.asarray(self.weight.T)          # pre-transpose once
            self._b = self.bias.reshape(1, input_dim)
        # Feature-table cache.  We hold a strong reference to the source
        # mapping so its id() cannot be recycled; if the mapping is mutated
        # in place, call invalidate_cache().
        self._cache_src = None
        self._cache_table = None
        self._cache_rows = None

    def invalidate_cache(self):
        self._cache_src = None
        self._cache_table = None
        self._cache_rows = None

    def _get_table(self, features_map):
        if self._cache_src is features_map and self._cache_table is not None:
            return self._cache_table, self._cache_rows
        if isinstance(features_map, dict):
            keys = sorted(features_map.keys())
            rows = {k: i for i, k in enumerate(keys)}
            table = jnp.stack(
                [jnp.asarray(features_map[k], jnp.float32) for k in keys], axis=0)
        else:
            rows = None
            table = jnp.asarray(features_map, jnp.float32)
        # Table kept at its true feature dim (no lane padding) so the in-kernel
        # gather reads only D*4 bytes per neighbor.
        self._cache_src = features_map
        self._cache_table = table
        self._cache_rows = rows
        return table, rows

    def __call__(self, inputs):
        u, neighs, features_map = inputs
        neighs = list(neighs)
        n = len(neighs)
        if n == 0:
            raise ValueError("Aggregator requires at least one neighbor.")
        table, rows = self._get_table(features_map)
        if rows is not None:
            ridx = [rows[v] for v in neighs]          # cheap host-side int lookups
        else:
            ridx = [int(v) for v in neighs]
        n_nodes = int(table.shape[0])
        if min(ridx) < 0 or max(ridx) >= n_nodes:
            raise KeyError("neighbor id not present in features_map")
        # Bucket the index buffer to a power of two (>=8): avoids per-n
        # recompiles; padded slots point at row 0 and are masked in-kernel.
        nb = _next_pow2_ge8(n)
        ridx = ridx + [0] * (nb - n)
        idx = jnp.asarray(ridx, dtype=jnp.int32)
        count = jnp.asarray([n], dtype=jnp.int32)
        return _aggregate(count, idx, table, self._wt, self._b,
                          agg_method=self.agg_method)


# --------------------------------------------------------------------- main -

if __name__ == "__main__":
    key = jax.random.PRNGKey(0)
    D = 32          # input_dim
    N_NODES = 16    # total nodes in the "graph"

    kfeat, kparam = jax.random.split(key)
    all_feats = jax.random.normal(kfeat, (N_NODES, D), jnp.float32)
    features_map = {i: all_feats[i] for i in range(N_NODES)}

    u = 0
    cases = [
        [1, 3, 5, 7, 9, 11, 13, 15],              # n=8  (exact chunk)
        [2, 4, 6, 8, 10],                          # n=5  (ragged masked tail)
        [i % N_NODES for i in range(200)],         # n=200 (multi-chunk pipeline)
    ]

    agg_mean = Aggregator(D, "mean")
    agg_max = Aggregator(D, "max")
    agg_pool = Aggregator(D, "pool", key=kparam)

    ok = True
    for neighs in cases:
        stacked = all_feats[jnp.asarray(neighs)]

        h_mean = jax.block_until_ready(agg_mean((u, neighs, features_map)))
        ok &= bool(jnp.allclose(h_mean, jnp.mean(stacked, axis=0),
                                atol=1e-5, rtol=1e-5))

        h_max = jax.block_until_ready(agg_max((u, neighs, features_map)))
        ok &= bool(jnp.allclose(h_max, jnp.max(stacked, axis=0),
                                atol=1e-5, rtol=1e-5))

        h_pool = jax.block_until_ready(agg_pool((u, neighs, features_map)))
        ref_pool = jax.nn.sigmoid(
            jnp.max(stacked @ agg_pool.weight.T + agg_pool.bias, axis=0))
        ok &= bool(jnp.allclose(h_pool, ref_pool, atol=1e-4, rtol=1e-4))

        assert h_mean.shape == (D,) and h_max.shape == (D,) and h_pool.shape == (D,)

    if ok:
        print("KERNEL_OK")
    else:
        print("MISMATCH")
</pallas_src>

<mosaic_0001>
module attributes {stable_mosaic.version = 11 : i64} {
  func.func @_agg_kernel(%arg0: i32, %arg1: memref<1xi32, #tpu.memory_space<smem>>, %arg2: memref<8xi32, #tpu.memory_space<smem>>, %arg3: memref<16x32xf32, #tpu.memory_space<any>>, %arg4: memref<1x32xf32, #tpu.memory_space<vmem>>, %arg5: memref<16x32xf32, #tpu.memory_space<vmem>>, %arg6: memref<2x!tpu.dma_semaphore, #tpu.memory_space<semaphore_mem>>, %arg7: memref<8x32xf32, #tpu.memory_space<vmem>>) attributes {dimension_semantics = [#tpu.dimension_semantics<arbitrary>], iteration_bounds = array<i64: 1>, scalar_prefetch = 2 : i64, scratch_operands = 3 : i64, tpu.core_type = #tpu.core_type<tc>, window_params = [{}, {pipeline_mode = #tpu.pipeline_mode<synchronous>, transform_indices = @transform_1, window_bounds = array<i64: 1, 32>}]} {
    %c0 = arith.constant 0 : index
    %0 = memref.load %arg1[%c0] : memref<1xi32, #tpu.memory_space<smem>>
    %c7_i32 = arith.constant 7 : i32
    %1 = arith.addi %0, %c7_i32 : i32
    %c8_i32 = arith.constant 8 : i32
    %2 = arith.divsi %1, %c8_i32 : i32
    %c0_i32 = arith.constant 0 : i32
    %c8_i32_0 = arith.constant 8 : i32
    %3 = arith.addi %c0_i32, %c8_i32_0 : i32
    %c1_i32 = arith.constant 1 : i32
    scf.for %arg8 = %c0_i32 to %3 step %c1_i32  : i32 {
      %c1_i32_17 = arith.constant 1 : i32
      %20 = arith.muli %arg8, %c1_i32_17 : i32
      %c0_i32_18 = arith.constant 0 : i32
      %21 = arith.addi %c0_i32_18, %20 : i32
      %c0_i32_19 = arith.constant 0 : i32
      %22 = arith.addi %c0_i32_19, %21 : i32
      %23 = arith.index_cast %22 : i32 to index
      %24 = memref.load %arg2[%23] : memref<8xi32, #tpu.memory_space<smem>>
      %c0_i32_20 = arith.constant 0 : i32
      %25 = arith.addi %c0_i32_20, %21 : i32
      %c0_i32_21 = arith.constant 0 : i32
      %c0_i32_22 = arith.constant 0 : i32
      %26 = tpu.memref_slice %arg3[%24, %c0_i32_22] : memref<16x32xf32, #tpu.memory_space<any>> -> memref<1x32xf32, #tpu.memory_space<any>>
      %c0_i32_23 = arith.constant 0 : i32
      %27 = tpu.memref_slice %arg5[%25, %c0_i32_23] : memref<16x32xf32, #tpu.memory_space<vmem>> -> memref<1x32xf32, #tpu.memory_space<vmem>>
      %28 = tpu.memref_slice %arg6[%c0_i32_21] : memref<2x!tpu.dma_semaphore, #tpu.memory_space<semaphore_mem>> -> memref<1x!tpu.dma_semaphore, #tpu.memory_space<semaphore_mem>>
      %29 = tpu.memref_squeeze %28 : memref<1x!tpu.dma_semaphore, #tpu.memory_space<semaphore_mem>> -> memref<!tpu.dma_semaphore, #tpu.memory_space<semaphore_mem>>
      tpu.enqueue_dma source(%26 : memref<1x32xf32, #tpu.memory_space<any>>) target(%27 : memref<1x32xf32, #tpu.memory_space<vmem>>) target_semaphore(%29 : memref<!tpu.dma_semaphore, #tpu.memory_space<semaphore_mem>>)
    }
    %c8_i32_1 = arith.constant 8 : i32
    %cst = arith.constant 0.000000e+00 : f32
    %4 = vector.broadcast %cst : f32 to vector<8x32xf32>
    %c0_2 = arith.constant 0 : index
    %c0_3 = arith.constant 0 : index
    %5 = vector.load %arg7[%c0_2, %c0_3] : memref<8x32xf32, #tpu.memory_space<vmem>>, vector<8x32xf32>
    tpu.vector_store %arg7[%c0_2, %c0_3], %4 {strides = array<i32>} : memref<8x32xf32, #tpu.memory_space<vmem>>, vector<8x32xf32>,
    %6 = tpu.iota {dimensions = array<i32: 0>} : vector<8x32xi32>
    %c0_i32_4 = arith.constant 0 : i32
    %7 = arith.subi %2, %c0_i32_4 : i32
    %c1_i32_5 = arith.constant 1 : i32
    %c1_i32_6 = arith.constant 1 : i32
    %8 = arith.subi %c1_i32_5, %c1_i32_6 : i32
    %9 = arith.addi %7, %8 : i32
    %c1_i32_7 = arith.constant 1 : i32
    %10 = arith.divsi %9, %c1_i32_7 : i32
    %c1_i32_8 = arith.constant 1 : i32
    %c0_i32_9 = arith.constant 0 : i32
    %c0_i32_10 = arith.constant 0 : i32
    %11 = arith.subi %10, %c0_i32_10 : i32
    %12 = arith.addi %c0_i32_10, %11 : i32
    %c1_i32_11 = arith.constant 1 : i32
    scf.for %arg8 = %c0_i32_10 to %12 step %c1_i32_11  : i32 {
      %20 = arith.muli %arg8, %c1_i32_8 : i32
      %21 = arith.addi %c0_i32_9, %20 : i32
      %c1_i32_17 = arith.constant 1 : i32
      %22 = arith.andi %21, %c1_i32_17 : i32
      %c8_i32_18 = arith.constant 8 : i32
      %23 = arith.muli %22, %c8_i32_18 : i32
      %c0_i32_19 = arith.constant 0 : i32
      %c8_i32_20 = arith.constant 8 : i32
      %24 = arith.addi %c0_i32_19, %c8_i32_20 : i32
      %c1_i32_21 = arith.constant 1 : i32
      scf.for %arg9 = %c0_i32_19 to %24 step %c1_i32_21  : i32 {
        %c1_i32_33 = arith.constant 1 : i32
        %43 = arith.muli %arg9, %c1_i32_33 : i32
        %c0_i32_34 = arith.constant 0 : i32
        %44 = arith.addi %c0_i32_34, %43 : i32
        %45 = arith.addi %23, %44 : i32
        %c0_i32_35 = arith.constant 0 : i32
        %c0_i32_36 = arith.constant 0 : i32
        %46 = tpu.memref_slice %arg3[%c0_i32_35, %c0_i32_36] : memref<16x32xf32, #tpu.memory_space<any>> -> memref<1x32xf32, #tpu.memory_space<any>>
        %c0_i32_37 = arith.constant 0 : i32
        %47 = tpu.memref_slice %arg5[%45, %c0_i32_37] : memref<16x32xf32, #tpu.memory_space<vmem>> -> memref<1x32xf32, #tpu.memory_space<vmem>>
        %48 = tpu.memref_slice %arg6[%22] : memref<2x!tpu.dma_semaphore, #tpu.memory_space<semaphore_mem>> -> memref<1x!tpu.dma_semaphore, #tpu.memory_space<semaphore_mem>>
        %49 = tpu.memref_squeeze %48 : memref<1x!tpu.dma_semaphore, #tpu.memory_space<semaphore_mem>> -> memref<!tpu.dma_semaphore, #tpu.memory_space<semaphore_mem>>
        tpu.wait_dma2 semaphore(%49 : memref<!tpu.dma_semaphore, #tpu.memory_space<semaphore_mem>>) src(%46 : memref<1x32xf32, #tpu.memory_space<any>>) dst(%47 : memref<1x32xf32, #tpu.memory_space<vmem>>)
      }
      %c8_i32_22 = arith.constant 8 : i32
      %c1_i32_23 = arith.constant 1 : i32
      %25 = arith.addi %21, %c1_i32_23 : i32
      %26 = arith.cmpi slt, %25, %2 : i32
      %27 = arith.extui %26 : i1 to i32
      %c0_i32_24 = arith.constant 0 : i32
      %28 = arith.cmpi ne, %27, %c0_i32_24 : i32
      scf.if %28 {
        %c1_i32_33 = arith.constant 1 : i32
        %43 = arith.addi %21, %c1_i32_33 : i32
        %c1_i32_34 = arith.constant 1 : i32
        %44 = arith.subi %c1_i32_34, %22 : i32
        %c8_i32_35 = arith.constant 8 : i32
        %45 = arith.muli %43, %c8_i32_35 : i32
        %c8_i32_36 = arith.constant 8 : i32
        %46 = arith.muli %44, %c8_i32_36 : i32
        %c0_i32_37 = arith.constant 0 : i32
        %c8_i32_38 = arith.constant 8 : i32
        %47 = arith.addi %c0_i32_37, %c8_i32_38 : i32
        %c1_i32_39 = arith.constant 1 : i32
        scf.for %arg9 = %c0_i32_37 to %47 step %c1_i32_39  : i32 {
          %c1_i32_41 = arith.constant 1 : i32
          %48 = arith.muli %arg9, %c1_i32_41 : i32
          %c0_i32_42 = arith.constant 0 : i32
          %49 = arith.addi %c0_i32_42, %48 : i32
          %50 = arith.addi %45, %49 : i32
          %51 = arith.index_cast %50 : i32 to index
          %52 = memref.load %arg2[%51] : memref<8xi32, #tpu.memory_space<smem>>
          %53 = arith.addi %46, %49 : i32
          %c0_i32_43 = arith.constant 0 : i32
          %54 = tpu.memref_slice %arg3[%52, %c0_i32_43] : memref<16x32xf32, #tpu.memory_space<any>> -> memref<1x32xf32, #tpu.memory_space<any>>
          %c0_i32_44 = arith.constant 0 : i32
          %55 = tpu.memref_slice %arg5[%53, %c0_i32_44] : memref<16x32xf32, #tpu.memory_space<vmem>> -> memref<1x32xf32, #tpu.memory_space<vmem>>
          %56 = tpu.memref_slice %arg6[%44] : memref<2x!tpu.dma_semaphore, #tpu.memory_space<semaphore_mem>> -> memref<1x!tpu.dma_semaphore, #tpu.memory_space<semaphore_mem>>
          %57 = tpu.memref_squeeze %56 : memref<1x!tpu.dma_semaphore, #tpu.memory_space<semaphore_mem>> -> memref<!tpu.dma_semaphore, #tpu.memory_space<semaphore_mem>>
          tpu.enqueue_dma source(%54 : memref<1x32xf32, #tpu.memory_space<any>>) target(%55 : memref<1x32xf32, #tpu.memory_space<vmem>>) target_semaphore(%57 : memref<!tpu.dma_semaphore, #tpu.memory_space<semaphore_mem>>)
        }
        %c8_i32_40 = arith.constant 8 : i32
      } else {
      }
      %c8_i32_25 = arith.constant 8 : i32
      %29 = arith.muli %22, %c8_i32_25 : i32
      %30 = tpu.assume_multiple %29, 8 : i32
      %31 = arith.index_cast %30 : i32 to index
      %c0_26 = arith.constant 0 : index
      %32 = vector.load %arg5[%31, %c0_26] : memref<16x32xf32, #tpu.memory_space<vmem>>, vector<8x32xf32>
      %c8_i32_27 = arith.constant 8 : i32
      %33 = arith.muli %21, %c8_i32_27 : i32
      %34 = vector.broadcast %33 : i32 to vector<8x32xi32>
      %35 = arith.addi %34, %6 : vector<8x32xi32>
      %36 = vector.broadcast %0 : i32 to vector<8x32xi32>
      %37 = arith.cmpi slt, %35, %36 : vector<8x32xi32>
      %cst_28 = arith.constant 0.000000e+00 : f32
      %38 = vector.broadcast %cst_28 : f32 to vector<8x32xf32>
      %39 = arith.select %37, %32, %38 : vector<8x32xi1>, vector<8x32xf32>
      %c0_29 = arith.constant 0 : index
      %c0_30 = arith.constant 0 : index
      %40 = vector.load %arg7[%c0_29, %c0_30] : memref<8x32xf32, #tpu.memory_space<vmem>>, vector<8x32xf32>
      %41 = arith.addf %40, %39 : vector<8x32xf32>
      %c0_31 = arith.constant 0 : index
      %c0_32 = arith.constant 0 : index
      %42 = vector.load %arg7[%c0_31, %c0_32] : memref<8x32xf32, #tpu.memory_space<vmem>>, vector<8x32xf32>
      tpu.vector_store %arg7[%c0_31, %c0_32], %41 {strides = array<i32>} : memref<8x32xf32, #tpu.memory_space<vmem>>, vector<8x32xf32>,
    }
    %c0_12 = arith.constant 0 : index
    %c0_13 = arith.constant 0 : index
    %13 = vector.load %arg7[%c0_12, %c0_13] : memref<8x32xf32, #tpu.memory_space<vmem>>, vector<8x32xf32>
    %cst_14 = arith.constant dense<0.000000e+00> : vector<32xf32>
    %14 = vector.multi_reduction <add>, %13, %cst_14 [0] : vector<8x32xf32> to vector<32xf32>
    %15 = vector.shape_cast %14 : vector<32xf32> to vector<1x32xf32>
    %16 = arith.sitofp %0 : i32 to f32
    %17 = vector.broadcast %16 : f32 to vector<1x32xf32>
    %18 = arith.divf %15, %17 : vector<1x32xf32>
    %c0_15 = arith.constant 0 : index
    %c0_16 = arith.constant 0 : index
    %19 = vector.load %arg4[%c0_15, %c0_16] : memref<1x32xf32, #tpu.memory_space<vmem>>, vector<1x32xf32>
    tpu.vector_store %arg4[%c0_15, %c0_16], %18 {strides = array<i32>} : memref<1x32xf32, #tpu.memory_space<vmem>>, vector<1x32xf32>,
    return
  }
  func.func @transform_1(%arg0: i32, %arg1: memref<1xi32, #tpu.memory_space<smem>>, %arg2: memref<8xi32, #tpu.memory_space<smem>>) -> (i32, i32) {
    %c0_i32 = arith.constant 0 : i32
    %c0_i32_0 = arith.constant 0 : i32
    %c0_i32_1 = arith.constant 0 : i32
    return %c0_i32, %c0_i32_0 : i32, i32
  }
}

</mosaic_0001>

<bundles_post_ra>
// kernel: _aggregate.1
= control target key start
LH: loop header
LB: loop body
LE: loop exit
PB: predicated region body
PF: predicated region fallthrough
CT: control target
= control target key end

     0   :  { %s370_s15 = smov [#allocation7]   ;;  %s506_s0 = inlined_call_operand.<no memory space> [shape: s32[1], index: 0, kind: input, shape index: {}]   ;;  %s507_s1 = inlined_call_operand.vmem [shape: s32[8], index: 1, kind: input, shape index: {}]   ;;  %s508_s2 = inlined_call_operand.hbm [shape: f32[16,32], index: 2, kind: input, shape index: {}]   ;;  %s509_s3 = inlined_call_operand.hbm [shape: f32[1,32], index: 3, kind: output, shape index: {}]  }
   0x1   :  { %s10_s14 = sshll.u32 %s507_s1, 4  ;;  %s11_s14 = int_to_ptr.vmem [resolvable:$true] %s10_s14 }
   0x2   :  { %13 = dma.vmem_to_smem %s11_s14, 16, %s370_s15, [#allocation5] }
   0x3   :  { %348 = dma.done.wait [#allocation5], 16 }
   0x4   :  { %349 = vsyncadd [#allocation5], 4294967280 }
   0x5   :  { %16 = sfence }
   0x6   :  { %17 = vsyncpa [#allocation9], 0  ;;  %s19_s18 = sadd.s32 7, %s506_s0  ;;  %s402_s23 = smov 0  }
   0x7   :  { %p20_p0 = scmp.lt.s32.totalorder %s19_s18, 0  ;;  %s21_s19 = ssub.s32 0, %s19_s18 }
   0x8   :  { %s200_s20 = smin.u32 %s21_s19, %s19_s18 }
   0x9   :  { %s23_s21 = sshrl.u32 %s200_s20, 3 }
   0xa   :  { %s24_s22 = ssub.s32 0, %s23_s21 }
   0xb   :  { %s513_s22 = smov (!%p20_p0, %s24_s22), %s23_s21 }
   0xc LB: > { %s32_s1 = sld [smem:[#allocation7 + %s356_s23]]  ;;  %s34_s24 = scalar_lea.vmem [#allocation2], %s356_s23  ;;  %s356_s23 = sphi %s402_s23, %s31_s23  }
   0xd   : > { %s44_s25 = sshll.u32 %s34_s24, 4  ;;  %s264_s7 = scalar_lea.hbm %s508_s2, 16  ;;  %s45_s25 = int_to_ptr.vmem [resolvable:$true] %s44_s25 }
  0x12   : > { %s33_s28 = scalar_lea.hbm %s508_s2, %s32_s1 }
  0x13   : > { %s42_s29 = sshll.u32 %s33_s28, 4  ;;  %s43_s29 = int_to_ptr.hbm [resolvable:$true] %s42_s29 }
  0x14   : > { %s260_s30 = sshra.s32 %s43_s29, 4  ;;  %s261_s30 = int_to_ptr.hbm [resolvable:$true] %s260_s30 }
  0x15   : > { %s262_s4 = scalar_lea.hbm %s261_s30, 1  ;;  %p265_p2 = scmp.lt.s32.totalorder %s261_s30, %s508_s2 }
  0x16   : > { %p263_p1 = scmp.ne.s32.totalorder %s261_s30, %s262_s4  ;;  %p266_p3 = scmp.lt.s32.totalorder %s264_s7, %s262_s4 }
  0x18   : > { %p267_p4 = por %p266_p3, %p265_p2 }
  0x1a   : > { %p268_p5 = pnand %p267_p4, %p263_p1 }
  0x1c   : > { %271 = shalt.err (!%p268_p5)  }
  0x1d   : > { %s272_s12 = sshra.s32 %s45_s25, 4  ;;  %s371_s14 = smov [#allocation2]   ;;  %s273_s12 = int_to_ptr.vmem [resolvable:$true] %s272_s12 }
  0x1e   : > { %s274_s13 = scalar_lea.vmem %s273_s12, 1  ;;  %s422_s15 = scalar_lea.vmem %s371_s14, 16 }
  0x1f   : > { %p275_p6 = scmp.ne.s32.totalorder %s273_s12, %s274_s13  ;;  %p277_p7 = scmp.lt.s32.totalorder %s273_s12, [#allocation2] }
  0x20   : > { %p278_p8 = scmp.lt.s32.totalorder %s422_s15, %s274_s13 }
  0x22   : > { %p279_p9 = por %p278_p8, %p277_p7 }
  0x24   : > { %p280_p10 = pnand %p279_p9, %p275_p6 }
  0x26   : > { %283 = shalt.err (!%p280_p10)  }
  0x27   : > { %47 = dma.hbm_to_vmem [thread:$0]  %s43_s29, 16, %s45_s25, [#allocation3] }
  0x28   : > { %s31_s23 = sadd.s32 1, %s356_s23  }
  0x29   : > { %p28_p11 = scmp.ge.s32.totalorder %s31_s23, 8  }
  0x2a   :  { %vm48_vm0 = vcmask (%p28_p11), 261120   ;;  %v50_v0 = vlaneseq (%p28_p11)  ;;  %v372_v1 = vmov (%p28_p11), 0.0   ;;  %p201_p12 = scmp.le.s32.totalorder (%p28_p11), %s513_s22, 0 }
  0x2b   :  { %30 = sbr.rel (!%p28_p11) target bundleno = 12 (0xc), region = 68  ;;  %49 = vst.msk [vmem:[#allocation4] sm:$0xff] (%p28_p11), %vm48_vm0, %v372_v1 }
  0x2c   :  { %v429_v2 = vshrl.u32 (%p28_p11), %v50_v0, 7 }
  0x30   :  { %197 = sbr.rel (%p201_p12) target bundleno = 115 (0x73), region = 95  ;;  %s432_s16 = smov (!%p201_p12), 0  }
  0x35 LB: > { %s438_s17 = sand.u32 1, %s360_s16  ;;  %s362_s19 = smov 0   ;;  %s360_s16 = sphi %s432_s16, %s511_s16  }
  0x36   : > { %s202_s18 = sshll.u32 %s438_s17, 3 }
  0x37 LB: >> { %s66_s20 = scalar_lea.sflag [#allocation3], %s438_s17  ;;  %s364_s19 = sphi %s362_s19, %s65_s19  }
  0x38   : >> { %350 = dma.done.wait %s66_s20, 16 }
  0x39   : >> { %351 = vsyncadd %s66_s20, 4294967280  ;;  %s65_s19 = sadd.s32 1, %s364_s19  }
  0x3a   : >> { %p62_p13 = scmp.ge.s32.totalorder %s65_s19, 8  }
  0x3b   : > { %s70_s21 = sadd.s32 (%p62_p13), 1, %s360_s16  }
  0x3c   : > { %64 = sbr.rel (!%p62_p13) target bundleno = 55 (0x37), region = 79  ;;  %p446_p0 = scmp.ge.s32.totalorder (%p62_p13), %s70_s21, %s513_s22 }
  0x41   : > { %74 = sbr.rel (%p446_p0) target bundleno = 106 (0x6a), region = 30  ;;  %s75_s1 = ssub.s32 (!%p446_p0), 1, %s438_s17 }
  0x42   : > { %s209_s24 = sshll.u32 (!%p446_p0), %s360_s16, 3  ;;  %s458_s26 = sshll.u32 (!%p446_p0), %s75_s1, 3 }
  0x43   : > { %s454_s25 = sadd.s32 (!%p446_p0), 8, %s209_s24  ;;  %s460_s27 = smov (!%p446_p0), 0  }
  0x46 LB: >> { %s84_s28 = sadd.s32 %s368_s27, %s454_s25  ;;  %s86_s29 = sadd.s32 %s368_s27, %s458_s26  ;;  %s368_s27 = sphi %s460_s27, %s83_s27  }
  0x47   : >> { %s85_s30 = sld [smem:[#allocation7 + %s84_s28]]  ;;  %s88_s4 = scalar_lea.vmem [#allocation2], %s86_s29 }
  0x48   : >> { %s99_s5 = sshll.u32 %s88_s4, 4  ;;  %s89_s11 = scalar_lea.sflag [#allocation3], %s75_s1  ;;  %s100_s5 = int_to_ptr.vmem [resolvable:$true] %s99_s5 }
  0x4d   : >> { %s87_s9 = scalar_lea.hbm %s508_s2, %s85_s30 }
  0x4e   : >> { %s97_s10 = sshll.u32 %s87_s9, 4  ;;  %s98_s10 = int_to_ptr.hbm [resolvable:$true] %s97_s10 }
  0x4f   : >> { %s284_s12 = sshra.s32 %s98_s10, 4  ;;  %s285_s12 = int_to_ptr.hbm [resolvable:$true] %s284_s12 }
  0x50   : >> { %s286_s13 = scalar_lea.hbm %s285_s12, 1  ;;  %p289_p2 = scmp.lt.s32.totalorder %s285_s12, %s508_s2 }
  0x51   : >> { %p287_p1 = scmp.ne.s32.totalorder %s285_s12, %s286_s13  ;;  %p290_p3 = scmp.lt.s32.totalorder %s264_s7, %s286_s13 }
  0x53   : >> { %p291_p4 = por %p290_p3, %p289_p2 }
  0x55   : >> { %p292_p5 = pnand %p291_p4, %p287_p1 }
  0x57   : >> { %295 = shalt.err (!%p292_p5)  }
  0x58   : >> { %s296_s28 = sshra.s32 %s100_s5, 4  ;;  %s297_s28 = int_to_ptr.vmem [resolvable:$true] %s296_s28 }
  0x59   : >> { %s298_s29 = scalar_lea.vmem %s297_s28, 1  ;;  %p301_p7 = scmp.lt.s32.totalorder %s297_s28, [#allocation2] }
  0x5a   : >> { %p299_p6 = scmp.ne.s32.totalorder %s297_s28, %s298_s29  ;;  %p302_p8 = scmp.lt.s32.totalorder %s422_s15, %s298_s29 }
  0x5c   : >> { %p303_p9 = por %p302_p8, %p301_p7 }
  0x5e   : >> { %p304_p10 = pnand %p303_p9, %p299_p6 }
  0x60   : >> { %307 = shalt.err (!%p304_p10)  }
  0x61   : >> { %102 = dma.hbm_to_vmem [thread:$0]  %s98_s10, 16, %s100_s5, %s89_s11 }
  0x62   : >> { %s83_s27 = sadd.s32 1, %s368_s27  }
  0x63   : >> { %p80_p11 = scmp.ge.s32.totalorder %s83_s27, 8  }
  0x65   : > { %82 = sbr.rel (!%p80_p11) target bundleno = 70 (0x46), region = 90 }
  0x6a PF: > { %s206_s30 = sshll.u32 %s360_s16, 3  ;;  %v108_v4 = vstv %s506_s0  ;;  %s103_s8 = scalar_lea.vmem [#allocation2], %s202_s18  ;;  %v111_v7 = vld [vmem:[#allocation4] sm:$0xff] }
  0x6b   : > { %v106_v3 = vstv %s206_s30  ;;  %v104_v5 = vld [vmem:[%s103_s8] sm:$0xff]  ;;  %s511_s16 = smov %s70_s21 }
  0x6c   : > { %v107_v6 = vadd.s32 %v106_v3, %v429_v2 }
  0x6e   : > { %vm109_vm1 = vcmp.lt.s32.totalorder %v107_v6, %v108_v4  ;;  %57 = sbr.rel (!%p446_p0) target bundleno = 53 (0x35), region = 101 }
  0x6f   : > { %v110_v8 = vsel %vm109_vm1, %v104_v5, 0.0 }
  0x70   : > { %v112_v9 = vadd.f32 %v111_v7, %v110_v8 }
  0x72   : > { %113 = vst.msk [vmem:[#allocation4] sm:$0xff] %vm48_vm0, %v112_v9 }
  0x73 PF:  { %s122_s1 = scvt.s32.f32 %s506_s0  ;;  %s373_s0 = smov [#allocation8]   ;;  %vm139_vm6 = vcmask 253952  }
  0x74   :  { %s146_s2 = sshll.u32 %s373_s0, 4  ;;  %s148_s15 = sshll.u32 %s509_s3, 4  ;;  %s147_s2 = int_to_ptr.vmem [resolvable:$true] %s146_s2  ;;  %s149_s15 = int_to_ptr.hbm [resolvable:$true] %s148_s15 }
  0x75   :  { %v123_v13 = vstv %s122_s1 }
  0x76   :  { %246 = vrcp.f32 %v123_v13  ;;  %vm129_vm2 = vweird.f32 %v123_v13  ;;  %v135_v19 = vand.u32 2147483648, %v123_v13  ;;  %v133_v22 = vand.u32 2147483647, %v123_v13 }
  0x78   :  { %v136_v24 = vor.u32 1.1754944e-38, %v135_v19  ;;  %vm134_vm5 = vcmp.eq.f32.partialorder %v133_v22, 8.507059e+37 }
  0x79   :  { %v114_v10 = vld [vmem:[#allocation4] sm:$0xff] }
  0x7a   :  { %v115_v11 = vsel %vm48_vm0, %v114_v10, 0.0 }
  0x7b   :  { %v116_v12 = vrot.slane %v115_v11, 4 }
  0x7c   :  { %v247_v17 = vpop.eup %246 }
  0x7d   :  { %v117_v14 = vadd.f32 %v116_v12, %v115_v11  ;;  %v125_v18 = vmul.f32 %v247_v17, %v123_v13  ;;  %vm130_vm3 = vweird.f32 %v247_v17 }
  0x7e   :  { %vm131_vm4 = vmor %vm129_vm2, %vm130_vm3 }
  0x7f   :  { %v118_v15 = vrot.slane %v117_v14, 2  ;;  %v126_v21 = vsub.f32 1.0, %v125_v18 }
  0x81   :  { %v119_v16 = vadd.f32 %v118_v15, %v117_v14  ;;  %v127_v23 = vmul.f32 %v247_v17, %v126_v21 }
  0x83   :  { %v120_v20 = vrot.slane %v119_v16, 1  ;;  %v128_v26 = vadd.f32 %v247_v17, %v127_v23 }
  0x85   :  { %v121_v25 = vadd.f32 %v120_v20, %v119_v16  ;;  %v132_v27 = vsel %vm131_vm4, %v247_v17, %v128_v26 }
  0x86   :  { %v137_v28 = vsel %vm134_vm5, %v136_v24, %v132_v27 }
  0x87   :  { %v138_v29 = vmul.f32 %v137_v28, %v121_v25 }
  0x89   :  { %140 = vst.msk [vmem:[#allocation8] sm:$0x1] %vm139_vm6, %v138_v29 }
  0x8a   :  { %151 = dma.vmem_to_hbm [thread:$0]  %s147_s2, 16, %s149_s15, [#allocation9]  }
  0x8b   :  { %352 = dma.done.wait [#allocation9], 16  }
  0x8c   :  { %353 = vsyncadd [#allocation9], 4294967280 }
  0x8d   :  { %156 = vsyncpa [#allocation9], 1 }
  0x8e   :  { %157 = vsyncmov [#allocation3] }
  0x91   :  { %s158_s16 = vpop.sfrf %157 }
  0x92   :  { %p207_p12 = scmp.ne.s32.totalorder %s158_s16, 0 }
  0x94   :  { %162 = shalt.err (%p207_p12)  }
  0x95   :  { %164 = vsyncmov [#allocation3 + $0x1] }
  0x98   :  { %s165_s21 = vpop.sfrf %164 }
  0x99   :  { %p208_p13 = scmp.ne.s32.totalorder %s165_s21, 0 }
  0x9b   :  { %169 = shalt.err (%p208_p13)  }

</bundles_post_ra>
